<compile_context>
chip_gen: v6e
topology: v6e:2x2x1
jax: 0.10.0
libtpu: 0.0.40
codegen_flags: <defaults>
</compile_context>

<pallas_src>
import math

import jax
import jax.numpy as jnp
from jax.experimental import pallas as pl
from jax.experimental.pallas import tpu as pltpu


def _speculator(x, beta, gamma, one_minus_gamma, plus_one=False):
    """a(x) = [gamma + (1 - gamma) * sigmoid(beta * x)] * x  (+1 if plus_one).

    Elementwise math stays in float32; only MXU operands are cast to bf16 by
    the caller.
    """
    sig = jax.nn.sigmoid(beta * x)
    y = (gamma + one_minus_gamma * sig) * x
    if plus_one:
        y = y + 1.0
    return y


def _decoder_kernel(
    s_ref,
    w1_ref, b1_ref, be1_ref, ga1_ref, og1_ref,
    w2_ref, b2_ref, be2_ref, ga2_ref, og2_ref,
    w3_ref, b3_ref, be3_ref, ga3_ref, og3_ref,
    w4_ref, b4_ref, be4_ref, ga4_ref, og4_ref,
    o_ref,
    h3_ref,
):
    # Grid: (batch tile i, wavelength tile j).  j is the inner sequential axis,
    # so the layer-1..3 result computed at j == 0 is reused for every
    # wavelength tile of the same batch tile via the h3 VMEM scratch.
    j = pl.program_id(1)

    @pl.when(j == 0)
    def _():
        x = s_ref[...]
        h = jnp.dot(x.astype(jnp.bfloat16), w1_ref[...],
                    preferred_element_type=jnp.float32) + b1_ref[...]
        h = _speculator(h, be1_ref[...], ga1_ref[...], og1_ref[...])

        h = jnp.dot(h.astype(jnp.bfloat16), w2_ref[...],
                    preferred_element_type=jnp.float32) + b2_ref[...]
        h = _speculator(h, be2_ref[...], ga2_ref[...], og2_ref[...])

        h = jnp.dot(h.astype(jnp.bfloat16), w3_ref[...],
                    preferred_element_type=jnp.float32) + b3_ref[...]
        h = _speculator(h, be3_ref[...], ga3_ref[...], og3_ref[...])

        h3_ref[...] = h

    h4 = jnp.dot(h3_ref[...].astype(jnp.bfloat16), w4_ref[...],
                 preferred_element_type=jnp.float32) + b4_ref[...]
    h4 = _speculator(h4, be4_ref[...], ga4_ref[...], og4_ref[...], plus_one=True)
    o_ref[...] = h4.astype(o_ref.dtype)


def _round_up(x, m):
    return ((x + m - 1) // m) * m


def _nbytes(shape, dtype):
    return math.prod(shape) * jnp.dtype(dtype).itemsize


def spectrum_decoder(s, params, *, tm=256, tn=512):
    """Run the fused SpectrumDecoder.decode Pallas kernel.

    s      : (N, n_latent) float32
    params : dict with W{i} (bf16, (in, out)) and b{i}/beta{i}/gamma{i}
             (f32, (1, out)) for i in 1..4
    tm     : batch tile (rows), multiple of 8
    tn     : wavelength tile (lanes), multiple of 128
    returns: (N, L) float32 restframe spectra
    """
    N, n_latent = s.shape
    H1 = params["W1"].shape[1]
    H2 = params["W2"].shape[1]
    H3 = params["W3"].shape[1]
    L = params["W4"].shape[1]

    # Clamp tiles to the (sublane/lane-aligned) problem size.
    tm = min(tm, _round_up(N, 8))
    tn = min(tn, _round_up(L, 128))
    grid = (pl.cdiv(N, tm), pl.cdiv(L, tn))

    # Fold (1 - gamma) once on the host side -> no per-element vsub in-kernel.
    omg = {i: (1.0 - params[f"gamma{i}"]).astype(jnp.float32) for i in range(1, 5)}

    operands = (
        s,
        params["W1"], params["b1"], params["beta1"], params["gamma1"], omg[1],
        params["W2"], params["b2"], params["beta2"], params["gamma2"], omg[2],
        params["W3"], params["b3"], params["beta3"], params["gamma3"], omg[3],
        params["W4"], params["b4"], params["beta4"], params["gamma4"], omg[4],
    )

    # Explicit index maps (no late-binding closures).
    def _batch_tile(i, j):   # latents: tiled over batch only
        return (i, 0)

    def _resident(i, j):     # layer 1-3 params: one block, stays resident in VMEM
        return (0, 0)

    def _col_tile(i, j):     # layer-4 params: tiled over wavelengths
        return (0, j)

    def _out_tile(i, j):
        return (i, j)

    in_specs = [
        pl.BlockSpec((tm, n_latent), _batch_tile),
        # layer 1 (resident)
        pl.BlockSpec((n_latent, H1), _resident),
        pl.BlockSpec((1, H1), _resident),
        pl.BlockSpec((1, H1), _resident),
        pl.BlockSpec((1, H1), _resident),
        pl.BlockSpec((1, H1), _resident),
        # layer 2 (resident)
        pl.BlockSpec((H1, H2), _resident),
        pl.BlockSpec((1, H2), _resident),
        pl.BlockSpec((1, H2), _resident),
        pl.BlockSpec((1, H2), _resident),
        pl.BlockSpec((1, H2), _resident),
        # layer 3 (resident)
        pl.BlockSpec((H2, H3), _resident),
        pl.BlockSpec((1, H3), _resident),
        pl.BlockSpec((1, H3), _resident),
        pl.BlockSpec((1, H3), _resident),
        pl.BlockSpec((1, H3), _resident),
        # layer 4 (wavelength-tiled)
        pl.BlockSpec((H3, tn), _col_tile),
        pl.BlockSpec((1, tn), _col_tile),
        pl.BlockSpec((1, tn), _col_tile),
        pl.BlockSpec((1, tn), _col_tile),
        pl.BlockSpec((1, tn), _col_tile),
    ]
    out_spec = pl.BlockSpec((tm, tn), _out_tile)

    # VMEM budget: 2x (double-buffered) per input tile + 2x output tile + scratch.
    def _tile2(shape, dtype):
        return 2 * _nbytes(shape, dtype)

    vmem_bytes = (
        _tile2((tm, n_latent), s.dtype)
        + _tile2((n_latent, H1), params["W1"].dtype) + 4 * _tile2((1, H1), jnp.float32)
        + _tile2((H1, H2), params["W2"].dtype) + 4 * _tile2((1, H2), jnp.float32)
        + _tile2((H2, H3), params["W3"].dtype) + 4 * _tile2((1, H3), jnp.float32)
        + _tile2((H3, tn), params["W4"].dtype) + 4 * _tile2((1, tn), jnp.float32)
        + _tile2((tm, tn), jnp.float32)            # output
        + _nbytes((tm, H3), jnp.float32)           # h3 scratch
    )
    vmem_limit = int(1.5 * vmem_bytes) + (4 << 20)
    vmem_limit = max(16 << 20, min(vmem_limit, 64 << 20))  # stay inside v7x's 64 MiB

    return pl.pallas_call(
        _decoder_kernel,
        out_shape=jax.ShapeDtypeStruct((N, L), jnp.float32),
        grid_spec=pltpu.PrefetchScalarGridSpec(
            num_scalar_prefetch=0,
            grid=grid,
            in_specs=in_specs,
            out_specs=out_spec,
            scratch_shapes=[pltpu.VMEM((tm, H3), jnp.float32)],
        ),
        compiler_params=pltpu.CompilerParams(
            dimension_semantics=("parallel", "arbitrary"),
            vmem_limit_bytes=vmem_limit,
        ),
    )(*operands)


def init_params(key, n_latent, n_hidden, n_wave):
    """Deterministic synthetic parameter init (shapes match the torch module).

    Weights are stored in bfloat16 (MXU operands); biases / beta / gamma stay
    float32 (VPU/EUP path).
    """
    dims = [n_latent, *n_hidden, n_wave]
    params = {}
    for i in range(4):
        n_in, n_out = dims[i], dims[i + 1]
        key, kw, kb, kbeta, kgamma = jax.random.split(key, 5)
        scale = 1.0 / jnp.sqrt(jnp.float32(n_in))
        params[f"W{i+1}"] = jax.random.uniform(
            kw, (n_in, n_out), jnp.float32, -scale, scale).astype(jnp.bfloat16)
        params[f"b{i+1}"] = jax.random.uniform(
            kb, (1, n_out), jnp.float32, -scale, scale)
        # SpeculatorActivation params: torch.randn(n_out)
        params[f"beta{i+1}"] = jax.random.normal(kbeta, (1, n_out), jnp.float32)
        params[f"gamma{i+1}"] = jax.random.normal(kgamma, (1, n_out), jnp.float32)
    return params


def reference_decode(s, params):
    """Pure-JAX reference (same bf16-operand / f32-accumulate precision)."""
    h = s
    for i in range(1, 5):
        h = jnp.dot(h.astype(jnp.bfloat16), params[f"W{i}"],
                    preferred_element_type=jnp.float32) + params[f"b{i}"]
        g = params[f"gamma{i}"]
        h = _speculator(h, params[f"beta{i}"], g, 1.0 - g, plus_one=(i == 4))
    return h


# TODO(synk): transform() (redshifting via interp1d, instrument LSF conv and
# calibration) is only reached when instrument/z are given; not implemented here
# since forward(s) with instrument=None, z=None skips it.

if __name__ == "__main__":
    # Small shapes consistent with the module: batch N, latent S, hidden dims,
    # L wavelengths.  Chosen so both grid axes (batch and wavelength) have
    # multiple tiles and the h3 scratch-reuse path is exercised.
    N = 128        # batch
    n_latent = 8   # latent dim (module default is 5; 8 picked for tidy sublanes)
    n_hidden = (16, 32, 64)
    L = 256        # len(wave_rest)

    key = jax.random.PRNGKey(0)
    key, ks = jax.random.split(key)
    s = jax.random.normal(ks, (N, n_latent), jnp.float32)
    params = init_params(key, n_latent, n_hidden, L)

    out = spectrum_decoder(s, params, tm=64, tn=128)   # grid (2, 2)
    out = jax.block_until_ready(out)

    ref = reference_decode(s, params)
    assert out.shape == (N, L)
    assert jnp.allclose(out, ref, atol=1e-2, rtol=1e-2), "mismatch vs reference"

    print("KERNEL_OK")
</pallas_src>

<mosaic_0001>
module attributes {stable_mosaic.version = 11 : i64} {
  func.func @_decoder_kernel(%arg0: i32, %arg1: i32, %arg2: memref<64x8xf32, #tpu.memory_space<vmem>>, %arg3: memref<8x16xbf16, #tpu.memory_space<vmem>>, %arg4: memref<1x16xf32, #tpu.memory_space<vmem>>, %arg5: memref<1x16xf32, #tpu.memory_space<vmem>>, %arg6: memref<1x16xf32, #tpu.memory_space<vmem>>, %arg7: memref<1x16xf32, #tpu.memory_space<vmem>>, %arg8: memref<16x32xbf16, #tpu.memory_space<vmem>>, %arg9: memref<1x32xf32, #tpu.memory_space<vmem>>, %arg10: memref<1x32xf32, #tpu.memory_space<vmem>>, %arg11: memref<1x32xf32, #tpu.memory_space<vmem>>, %arg12: memref<1x32xf32, #tpu.memory_space<vmem>>, %arg13: memref<32x64xbf16, #tpu.memory_space<vmem>>, %arg14: memref<1x64xf32, #tpu.memory_space<vmem>>, %arg15: memref<1x64xf32, #tpu.memory_space<vmem>>, %arg16: memref<1x64xf32, #tpu.memory_space<vmem>>, %arg17: memref<1x64xf32, #tpu.memory_space<vmem>>, %arg18: memref<64x128xbf16, #tpu.memory_space<vmem>>, %arg19: memref<1x128xf32, #tpu.memory_space<vmem>>, %arg20: memref<1x128xf32, #tpu.memory_space<vmem>>, %arg21: memref<1x128xf32, #tpu.memory_space<vmem>>, %arg22: memref<1x128xf32, #tpu.memory_space<vmem>>, %arg23: memref<64x128xf32, #tpu.memory_space<vmem>>, %arg24: memref<64x64xf32, #tpu.memory_space<vmem>>) attributes {dimension_semantics = [#tpu.dimension_semantics<parallel>, #tpu.dimension_semantics<arbitrary>], iteration_bounds = array<i64: 2, 2>, scalar_prefetch = 0 : i64, scratch_operands = 1 : i64, tpu.core_type = #tpu.core_type<tc>, window_params = [{transform_indices = @transform_0, window_bounds = array<i64: 64, 8>}, {pipeline_mode = #tpu.pipeline_mode<synchronous>, transform_indices = @transform_1, window_bounds = array<i64: 8, 16>}, {pipeline_mode = #tpu.pipeline_mode<synchronous>, transform_indices = @transform_2, window_bounds = array<i64: 1, 16>}, {pipeline_mode = #tpu.pipeline_mode<synchronous>, transform_indices = @transform_3, window_bounds = array<i64: 1, 16>}, {pipeline_mode = #tpu.pipeline_mode<synchronous>, transform_indices = @transform_4, window_bounds = array<i64: 1, 16>}, {pipeline_mode = #tpu.pipeline_mode<synchronous>, transform_indices = @transform_5, window_bounds = array<i64: 1, 16>}, {pipeline_mode = #tpu.pipeline_mode<synchronous>, transform_indices = @transform_6, window_bounds = array<i64: 16, 32>}, {pipeline_mode = #tpu.pipeline_mode<synchronous>, transform_indices = @transform_7, window_bounds = array<i64: 1, 32>}, {pipeline_mode = #tpu.pipeline_mode<synchronous>, transform_indices = @transform_8, window_bounds = array<i64: 1, 32>}, {pipeline_mode = #tpu.pipeline_mode<synchronous>, transform_indices = @transform_9, window_bounds = array<i64: 1, 32>}, {pipeline_mode = #tpu.pipeline_mode<synchronous>, transform_indices = @transform_10, window_bounds = array<i64: 1, 32>}, {pipeline_mode = #tpu.pipeline_mode<synchronous>, transform_indices = @transform_11, window_bounds = array<i64: 32, 64>}, {pipeline_mode = #tpu.pipeline_mode<synchronous>, transform_indices = @transform_12, window_bounds = array<i64: 1, 64>}, {pipeline_mode = #tpu.pipeline_mode<synchronous>, transform_indices = @transform_13, window_bounds = array<i64: 1, 64>}, {pipeline_mode = #tpu.pipeline_mode<synchronous>, transform_indices = @transform_14, window_bounds = array<i64: 1, 64>}, {pipeline_mode = #tpu.pipeline_mode<synchronous>, transform_indices = @transform_15, window_bounds = array<i64: 1, 64>}, {transform_indices = @transform_16, window_bounds = array<i64: 64, 128>}, {transform_indices = @transform_17, window_bounds = array<i64: 1, 128>}, {transform_indices = @transform_18, window_bounds = array<i64: 1, 128>}, {transform_indices = @transform_19, window_bounds = array<i64: 1, 128>}, {transform_indices = @transform_20, window_bounds = array<i64: 1, 128>}, {transform_indices = @transform_21, window_bounds = array<i64: 64, 128>}]} {
    %c0_i32 = arith.constant 0 : i32
    %0 = arith.cmpi eq, %arg1, %c0_i32 : i32
    %1 = arith.extui %0 : i1 to i32
    %c0_i32_0 = arith.constant 0 : i32
    %2 = arith.cmpi ne, %1, %c0_i32_0 : i32
    scf.if %2 {
      %c0_16 = arith.constant 0 : index
      %c0_17 = arith.constant 0 : index
      %28 = vector.load %arg2[%c0_16, %c0_17] : memref<64x8xf32, #tpu.memory_space<vmem>>, vector<64x8xf32>
      %29 = arith.truncf %28 : vector<64x8xf32> to vector<64x8xbf16>
      %c0_18 = arith.constant 0 : index
      %c0_19 = arith.constant 0 : index
      %30 = vector.load %arg3[%c0_18, %c0_19] : memref<8x16xbf16, #tpu.memory_space<vmem>>, vector<8x16xbf16>
      %cst_20 = arith.constant dense<0.000000e+00> : vector<64x16xf32>
      %31 = tpu.matmul %29, %30, %cst_20 {dimension_numbers = #tpu.dot_dimension_numbers<[1], [0], [0], [1], [0, 0, 1, 1], [], []>} : vector<64x8xbf16>, vector<8x16xbf16>, vector<64x16xf32> -> vector<64x16xf32>
      %c0_21 = arith.constant 0 : index
      %c0_22 = arith.constant 0 : index
      %32 = vector.load %arg4[%c0_21, %c0_22] : memref<1x16xf32, #tpu.memory_space<vmem>>, vector<1x16xf32>
      %33 = vector.broadcast %32 : vector<1x16xf32> to vector<64x16xf32>
      %34 = arith.addf %31, %33 : vector<64x16xf32>
      %c0_23 = arith.constant 0 : index
      %c0_24 = arith.constant 0 : index
      %35 = vector.load %arg5[%c0_23, %c0_24] : memref<1x16xf32, #tpu.memory_space<vmem>>, vector<1x16xf32>
      %c0_25 = arith.constant 0 : index
      %c0_26 = arith.constant 0 : index
      %36 = vector.load %arg6[%c0_25, %c0_26] : memref<1x16xf32, #tpu.memory_space<vmem>>, vector<1x16xf32>
      %c0_27 = arith.constant 0 : index
      %c0_28 = arith.constant 0 : index
      %37 = vector.load %arg7[%c0_27, %c0_28] : memref<1x16xf32, #tpu.memory_space<vmem>>, vector<1x16xf32>
      %38 = vector.broadcast %35 : vector<1x16xf32> to vector<64x16xf32>
      %39 = arith.mulf %38, %34 : vector<64x16xf32>
      %40 = arith.negf %39 : vector<64x16xf32>
      %41 = math.exp %40 : vector<64x16xf32>
      %cst_29 = arith.constant 1.000000e+00 : f32
      %42 = vector.broadcast %cst_29 : f32 to vector<64x16xf32>
      %43 = arith.addf %42, %41 : vector<64x16xf32>
      %44 = arith.divf %42, %43 : vector<64x16xf32>
      %45 = vector.broadcast %37 : vector<1x16xf32> to vector<64x16xf32>
      %46 = arith.mulf %45, %44 : vector<64x16xf32>
      %47 = vector.broadcast %36 : vector<1x16xf32> to vector<64x16xf32>
      %48 = arith.addf %47, %46 : vector<64x16xf32>
      %49 = arith.mulf %48, %34 : vector<64x16xf32>
      %50 = arith.truncf %49 : vector<64x16xf32> to vector<64x16xbf16>
      %c0_30 = arith.constant 0 : index
      %c0_31 = arith.constant 0 : index
      %51 = vector.load %arg8[%c0_30, %c0_31] : memref<16x32xbf16, #tpu.memory_space<vmem>>, vector<16x32xbf16>
      %cst_32 = arith.constant dense<0.000000e+00> : vector<64x32xf32>
      %52 = tpu.matmul %50, %51, %cst_32 {dimension_numbers = #tpu.dot_dimension_numbers<[1], [0], [0], [1], [0, 0, 1, 1], [], []>} : vector<64x16xbf16>, vector<16x32xbf16>, vector<64x32xf32> -> vector<64x32xf32>
      %c0_33 = arith.constant 0 : index
      %c0_34 = arith.constant 0 : index
      %53 = vector.load %arg9[%c0_33, %c0_34] : memref<1x32xf32, #tpu.memory_space<vmem>>, vector<1x32xf32>
      %54 = vector.broadcast %53 : vector<1x32xf32> to vector<64x32xf32>
      %55 = arith.addf %52, %54 : vector<64x32xf32>
      %c0_35 = arith.constant 0 : index
      %c0_36 = arith.constant 0 : index
      %56 = vector.load %arg10[%c0_35, %c0_36] : memref<1x32xf32, #tpu.memory_space<vmem>>, vector<1x32xf32>
      %c0_37 = arith.constant 0 : index
      %c0_38 = arith.constant 0 : index
      %57 = vector.load %arg11[%c0_37, %c0_38] : memref<1x32xf32, #tpu.memory_space<vmem>>, vector<1x32xf32>
      %c0_39 = arith.constant 0 : index
      %c0_40 = arith.constant 0 : index
      %58 = vector.load %arg12[%c0_39, %c0_40] : memref<1x32xf32, #tpu.memory_space<vmem>>, vector<1x32xf32>
      %59 = vector.broadcast %56 : vector<1x32xf32> to vector<64x32xf32>
      %60 = arith.mulf %59, %55 : vector<64x32xf32>
      %61 = arith.negf %60 : vector<64x32xf32>
      %62 = math.exp %61 : vector<64x32xf32>
      %cst_41 = arith.constant 1.000000e+00 : f32
      %63 = vector.broadcast %cst_41 : f32 to vector<64x32xf32>
      %64 = arith.addf %63, %62 : vector<64x32xf32>
      %65 = arith.divf %63, %64 : vector<64x32xf32>
      %66 = vector.broadcast %58 : vector<1x32xf32> to vector<64x32xf32>
      %67 = arith.mulf %66, %65 : vector<64x32xf32>
      %68 = vector.broadcast %57 : vector<1x32xf32> to vector<64x32xf32>
      %69 = arith.addf %68, %67 : vector<64x32xf32>
      %70 = arith.mulf %69, %55 : vector<64x32xf32>
      %71 = arith.truncf %70 : vector<64x32xf32> to vector<64x32xbf16>
      %c0_42 = arith.constant 0 : index
      %c0_43 = arith.constant 0 : index
      %72 = vector.load %arg13[%c0_42, %c0_43] : memref<32x64xbf16, #tpu.memory_space<vmem>>, vector<32x64xbf16>
      %cst_44 = arith.constant dense<0.000000e+00> : vector<64x64xf32>
      %73 = tpu.matmul %71, %72, %cst_44 {dimension_numbers = #tpu.dot_dimension_numbers<[1], [0], [0], [1], [0, 0, 1, 1], [], []>} : vector<64x32xbf16>, vector<32x64xbf16>, vector<64x64xf32> -> vector<64x64xf32>
      %c0_45 = arith.constant 0 : index
      %c0_46 = arith.constant 0 : index
      %74 = vector.load %arg14[%c0_45, %c0_46] : memref<1x64xf32, #tpu.memory_space<vmem>>, vector<1x64xf32>
      %75 = vector.broadcast %74 : vector<1x64xf32> to vector<64x64xf32>
      %76 = arith.addf %73, %75 : vector<64x64xf32>
      %c0_47 = arith.constant 0 : index
      %c0_48 = arith.constant 0 : index
      %77 = vector.load %arg15[%c0_47, %c0_48] : memref<1x64xf32, #tpu.memory_space<vmem>>, vector<1x64xf32>
      %c0_49 = arith.constant 0 : index
      %c0_50 = arith.constant 0 : index
      %78 = vector.load %arg16[%c0_49, %c0_50] : memref<1x64xf32, #tpu.memory_space<vmem>>, vector<1x64xf32>
      %c0_51 = arith.constant 0 : index
      %c0_52 = arith.constant 0 : index
      %79 = vector.load %arg17[%c0_51, %c0_52] : memref<1x64xf32, #tpu.memory_space<vmem>>, vector<1x64xf32>
      %80 = vector.broadcast %77 : vector<1x64xf32> to vector<64x64xf32>
      %81 = arith.mulf %80, %76 : vector<64x64xf32>
      %82 = arith.negf %81 : vector<64x64xf32>
      %83 = math.exp %82 : vector<64x64xf32>
      %cst_53 = arith.constant 1.000000e+00 : f32
      %84 = vector.broadcast %cst_53 : f32 to vector<64x64xf32>
      %85 = arith.addf %84, %83 : vector<64x64xf32>
      %86 = arith.divf %84, %85 : vector<64x64xf32>
      %87 = vector.broadcast %79 : vector<1x64xf32> to vector<64x64xf32>
      %88 = arith.mulf %87, %86 : vector<64x64xf32>
      %89 = vector.broadcast %78 : vector<1x64xf32> to vector<64x64xf32>
      %90 = arith.addf %89, %88 : vector<64x64xf32>
      %91 = arith.mulf %90, %76 : vector<64x64xf32>
      %c0_54 = arith.constant 0 : index
      %c0_55 = arith.constant 0 : index
      %92 = vector.load %arg24[%c0_54, %c0_55] : memref<64x64xf32, #tpu.memory_space<vmem>>, vector<64x64xf32>
      tpu.vector_store %arg24[%c0_54, %c0_55], %91 {strides = array<i32>} : memref<64x64xf32, #tpu.memory_space<vmem>>, vector<64x64xf32>,
    } else {
    }
    %c0 = arith.constant 0 : index
    %c0_1 = arith.constant 0 : index
    %3 = vector.load %arg24[%c0, %c0_1] : memref<64x64xf32, #tpu.memory_space<vmem>>, vector<64x64xf32>
    %4 = arith.truncf %3 : vector<64x64xf32> to vector<64x64xbf16>
    %c0_2 = arith.constant 0 : index
    %c0_3 = arith.constant 0 : index
    %5 = vector.load %arg18[%c0_2, %c0_3] : memref<64x128xbf16, #tpu.memory_space<vmem>>, vector<64x128xbf16>
    %cst = arith.constant dense<0.000000e+00> : vector<64x128xf32>
    %6 = tpu.matmul %4, %5, %cst {dimension_numbers = #tpu.dot_dimension_numbers<[1], [0], [0], [1], [0, 0, 1, 1], [], []>} : vector<64x64xbf16>, vector<64x128xbf16>, vector<64x128xf32> -> vector<64x128xf32>
    %c0_4 = arith.constant 0 : index
    %c0_5 = arith.constant 0 : index
    %7 = vector.load %arg19[%c0_4, %c0_5] : memref<1x128xf32, #tpu.memory_space<vmem>>, vector<1x128xf32>
    %8 = vector.broadcast %7 : vector<1x128xf32> to vector<64x128xf32>
    %9 = arith.addf %6, %8 : vector<64x128xf32>
    %c0_6 = arith.constant 0 : index
    %c0_7 = arith.constant 0 : index
    %10 = vector.load %arg20[%c0_6, %c0_7] : memref<1x128xf32, #tpu.memory_space<vmem>>, vector<1x128xf32>
    %c0_8 = arith.constant 0 : index
    %c0_9 = arith.constant 0 : index
    %11 = vector.load %arg21[%c0_8, %c0_9] : memref<1x128xf32, #tpu.memory_space<vmem>>, vector<1x128xf32>
    %c0_10 = arith.constant 0 : index
    %c0_11 = arith.constant 0 : index
    %12 = vector.load %arg22[%c0_10, %c0_11] : memref<1x128xf32, #tpu.memory_space<vmem>>, vector<1x128xf32>
    %13 = vector.broadcast %10 : vector<1x128xf32> to vector<64x128xf32>
    %14 = arith.mulf %13, %9 : vector<64x128xf32>
    %15 = arith.negf %14 : vector<64x128xf32>
    %16 = math.exp %15 : vector<64x128xf32>
    %cst_12 = arith.constant 1.000000e+00 : f32
    %17 = vector.broadcast %cst_12 : f32 to vector<64x128xf32>
    %18 = arith.addf %17, %16 : vector<64x128xf32>
    %19 = arith.divf %17, %18 : vector<64x128xf32>
    %20 = vector.broadcast %12 : vector<1x128xf32> to vector<64x128xf32>
    %21 = arith.mulf %20, %19 : vector<64x128xf32>
    %22 = vector.broadcast %11 : vector<1x128xf32> to vector<64x128xf32>
    %23 = arith.addf %22, %21 : vector<64x128xf32>
    %24 = arith.mulf %23, %9 : vector<64x128xf32>
    %cst_13 = arith.constant 1.000000e+00 : f32
    %25 = vector.broadcast %cst_13 : f32 to vector<64x128xf32>
    %26 = arith.addf %24, %25 : vector<64x128xf32>
    %c0_14 = arith.constant 0 : index
    %c0_15 = arith.constant 0 : index
    %27 = vector.load %arg23[%c0_14, %c0_15] : memref<64x128xf32, #tpu.memory_space<vmem>>, vector<64x128xf32>
    tpu.vector_store %arg23[%c0_14, %c0_15], %26 {strides = array<i32>} : memref<64x128xf32, #tpu.memory_space<vmem>>, vector<64x128xf32>,
    return
  }
  func.func @transform_0(%arg0: i32, %arg1: i32) -> (i32, i32) {
    %c0_i32 = arith.constant 0 : i32
    %c0_i32_0 = arith.constant 0 : i32
    return %arg0, %c0_i32 : i32, i32
  }
  func.func @transform_1(%arg0: i32, %arg1: i32) -> (i32, i32) {
    %c0_i32 = arith.constant 0 : i32
    %c0_i32_0 = arith.constant 0 : i32
    %c0_i32_1 = arith.constant 0 : i32
    return %c0_i32, %c0_i32_0 : i32, i32
  }
  func.func @transform_2(%arg0: i32, %arg1: i32) -> (i32, i32) {
    %c0_i32 = arith.constant 0 : i32
    %c0_i32_0 = arith.constant 0 : i32
    %c0_i32_1 = arith.constant 0 : i32
    return %c0_i32, %c0_i32_0 : i32, i32
  }
  func.func @transform_3(%arg0: i32, %arg1: i32) -> (i32, i32) {
    %c0_i32 = arith.constant 0 : i32
    %c0_i32_0 = arith.constant 0 : i32
    %c0_i32_1 = arith.constant 0 : i32
    return %c0_i32, %c0_i32_0 : i32, i32
  }
  func.func @transform_4(%arg0: i32, %arg1: i32) -> (i32, i32) {
    %c0_i32 = arith.constant 0 : i32
    %c0_i32_0 = arith.constant 0 : i32
    %c0_i32_1 = arith.constant 0 : i32
    return %c0_i32, %c0_i32_0 : i32, i32
  }
  func.func @transform_5(%arg0: i32, %arg1: i32) -> (i32, i32) {
    %c0_i32 = arith.constant 0 : i32
    %c0_i32_0 = arith.constant 0 : i32
    %c0_i32_1 = arith.constant 0 : i32
    return %c0_i32, %c0_i32_0 : i32, i32
  }
  func.func @transform_6(%arg0: i32, %arg1: i32) -> (i32, i32) {
    %c0_i32 = arith.constant 0 : i32
    %c0_i32_0 = arith.constant 0 : i32
    %c0_i32_1 = arith.constant 0 : i32
    return %c0_i32, %c0_i32_0 : i32, i32
  }
  func.func @transform_7(%arg0: i32, %arg1: i32) -> (i32, i32) {
    %c0_i32 = arith.constant 0 : i32
    %c0_i32_0 = arith.constant 0 : i32
    %c0_i32_1 = arith.constant 0 : i32
    return %c0_i32, %c0_i32_0 : i32, i32
  }
  func.func @transform_8(%arg0: i32, %arg1: i32) -> (i32, i32) {
    %c0_i32 = arith.constant 0 : i32
    %c0_i32_0 = arith.constant 0 : i32
    %c0_i32_1 = arith.constant 0 : i32
    return %c0_i32, %c0_i32_0 : i32, i32
  }
  func.func @transform_9(%arg0: i32, %arg1: i32) -> (i32, i32) {
    %c0_i32 = arith.constant 0 : i32
    %c0_i32_0 = arith.constant 0 : i32
    %c0_i32_1 = arith.constant 0 : i32
    return %c0_i32, %c0_i32_0 : i32, i32
  }
  func.func @transform_10(%arg0: i32, %arg1: i32) -> (i32, i32) {
    %c0_i32 = arith.constant 0 : i32
    %c0_i32_0 = arith.constant 0 : i32
    %c0_i32_1 = arith.constant 0 : i32
    return %c0_i32, %c0_i32_0 : i32, i32
  }
  func.func @transform_11(%arg0: i32, %arg1: i32) -> (i32, i32) {
    %c0_i32 = arith.constant 0 : i32
    %c0_i32_0 = arith.constant 0 : i32
    %c0_i32_1 = arith.constant 0 : i32
    return %c0_i32, %c0_i32_0 : i32, i32
  }
  func.func @transform_12(%arg0: i32, %arg1: i32) -> (i32, i32) {
    %c0_i32 = arith.constant 0 : i32
    %c0_i32_0 = arith.constant 0 : i32
    %c0_i32_1 = arith.constant 0 : i32
    return %c0_i32, %c0_i32_0 : i32, i32
  }
  func.func @transform_13(%arg0: i32, %arg1: i32) -> (i32, i32) {
    %c0_i32 = arith.constant 0 : i32
    %c0_i32_0 = arith.constant 0 : i32
    %c0_i32_1 = arith.constant 0 : i32
    return %c0_i32, %c0_i32_0 : i32, i32
  }
  func.func @transform_14(%arg0: i32, %arg1: i32) -> (i32, i32) {
    %c0_i32 = arith.constant 0 : i32
    %c0_i32_0 = arith.constant 0 : i32
    %c0_i32_1 = arith.constant 0 : i32
    return %c0_i32, %c0_i32_0 : i32, i32
  }
  func.func @transform_15(%arg0: i32, %arg1: i32) -> (i32, i32) {
    %c0_i32 = arith.constant 0 : i32
    %c0_i32_0 = arith.constant 0 : i32
    %c0_i32_1 = arith.constant 0 : i32
    return %c0_i32, %c0_i32_0 : i32, i32
  }
  func.func @transform_16(%arg0: i32, %arg1: i32) -> (i32, i32) {
    %c0_i32 = arith.constant 0 : i32
    %c0_i32_0 = arith.constant 0 : i32
    return %c0_i32, %arg1 : i32, i32
  }
  func.func @transform_17(%arg0: i32, %arg1: i32) -> (i32, i32) {
    %c0_i32 = arith.constant 0 : i32
    %c0_i32_0 = arith.constant 0 : i32
    return %c0_i32, %arg1 : i32, i32
  }
  func.func @transform_18(%arg0: i32, %arg1: i32) -> (i32, i32) {
    %c0_i32 = arith.constant 0 : i32
    %c0_i32_0 = arith.constant 0 : i32
    return %c0_i32, %arg1 : i32, i32
  }
  func.func @transform_19(%arg0: i32, %arg1: i32) -> (i32, i32) {
    %c0_i32 = arith.constant 0 : i32
    %c0_i32_0 = arith.constant 0 : i32
    return %c0_i32, %arg1 : i32, i32
  }
  func.func @transform_20(%arg0: i32, %arg1: i32) -> (i32, i32) {
    %c0_i32 = arith.constant 0 : i32
    %c0_i32_0 = arith.constant 0 : i32
    return %c0_i32, %arg1 : i32, i32
  }
  func.func @transform_21(%arg0: i32, %arg1: i32) -> (i32, i32) {
    %c0_i32 = arith.constant 0 : i32
    return %arg0, %arg1 : i32, i32
  }
}

</mosaic_0001>

<bundles_post_ra>
// kernel: tpu_custom_call.1
= control target key start
LH: loop header
LB: loop body
LE: loop exit
PB: predicated region body
PF: predicated region fallthrough
CT: control target
= control target key end

     0   :  { %s2884_s0 = inlined_call_operand.vmem [shape: f32[128,8], index: 0, kind: input, shape index: {}]   ;;  %s2885_s1 = inlined_call_operand.vmem [shape: bf16[8,16], index: 1, kind: input, shape index: {}]   ;;  %s2886_s2 = inlined_call_operand.vmem [shape: f32[1,16], index: 2, kind: input, shape index: {}]   ;;  %s2887_s3 = inlined_call_operand.vmem [shape: f32[1,16], index: 3, kind: input, shape index: {}]   ;;  %s2888_s4 = inlined_call_operand.vmem [shape: f32[1,16], index: 4, kind: input, shape index: {}]   ;;  %s2889_s5 = inlined_call_operand.vmem [shape: f32[1,16], index: 5, kind: input, shape index: {}]   ;;  %s2890_s6 = inlined_call_operand.vmem [shape: bf16[16,32], index: 6, kind: input, shape index: {}]   ;;  %s2891_s7 = inlined_call_operand.vmem [shape: f32[1,32], index: 7, kind: input, shape index: {}]   ;;  %s2892_s8 = inlined_call_operand.vmem [shape: f32[1,32], index: 8, kind: input, shape index: {}]   ;;  %s2893_s9 = inlined_call_operand.vmem [shape: f32[1,32], index: 9, kind: input, shape index: {}]   ;;  %s2894_s10 = inlined_call_operand.vmem [shape: f32[1,32], index: 10, kind: input, shape index: {}]   ;;  %s2895_s11 = inlined_call_operand.vmem [shape: bf16[32,64], index: 11, kind: input, shape index: {}]   ;;  %s2896_s12 = inlined_call_operand.vmem [shape: f32[1,64], index: 12, kind: input, shape index: {}]   ;;  %s2897_s13 = inlined_call_operand.vmem [shape: f32[1,64], index: 13, kind: input, shape index: {}]   ;;  %s2898_s14 = inlined_call_operand.vmem [shape: f32[1,64], index: 14, kind: input, shape index: {}]   ;;  %s2899_s15 = inlined_call_operand.vmem [shape: f32[1,64], index: 15, kind: input, shape index: {}]   ;;  %s2900_s16 = inlined_call_operand.vmem [shape: bf16[64,256], index: 16, kind: input, shape index: {}]   ;;  %s2901_s17 = inlined_call_operand.vmem [shape: f32[1,256], index: 17, kind: input, shape index: {}]   ;;  %s2902_s18 = inlined_call_operand.vmem [shape: f32[1,256], index: 18, kind: input, shape index: {}]   ;;  %s2903_s19 = inlined_call_operand.vmem [shape: f32[1,256], index: 19, kind: input, shape index: {}]   ;;  %s2904_s20 = inlined_call_operand.vmem [shape: f32[1,256], index: 20, kind: input, shape index: {}]   ;;  %s2905_s21 = inlined_call_operand.hbm [shape: f32[128,256], index: 21, kind: output, shape index: {}]  }
   0x1   :  { %2921 = sst [smem:[#allocation20_spill]] %s2884_s0 }
   0x2   :  { %2922 = sst [smem:[#allocation21_spill]] %s2885_s1 }
   0x3   :  { %2923 = sst [smem:[#allocation22_spill]] %s2886_s2 }
   0x4   :  { %2924 = sst [smem:[#allocation23_spill]] %s2887_s3 }
   0x5   :  { %2925 = sst [smem:[#allocation24_spill]] %s2888_s4 }
   0x6   :  { %2926 = sst [smem:[#allocation25_spill]] %s2889_s5 }
   0x7   :  { %2927 = sst [smem:[#allocation26_spill]] %s2892_s8 }
   0x8   :  { %2928 = sst [smem:[#allocation27_spill]] %s2893_s9 }
   0x9   :  { %2929 = sst [smem:[#allocation28_spill]] %s2894_s10 }
   0xa   :  { %2930 = sst [smem:[#allocation29_spill]] %s2896_s12 }
   0xb   :  { %2931 = sst [smem:[#allocation30_spill]] %s2897_s13 }
   0xc   :  { %2932 = sst [smem:[#allocation31_spill]] %s2898_s14 }
   0xd   :  { %2933 = sst [smem:[#allocation32_spill]] %s2899_s15 }
   0xe   :  { %2934 = sst [smem:[#allocation33_spill]] %s2900_s16 }
   0xf   :  { %2935 = sst [smem:[#allocation34_spill]] %s2905_s21 }
  0x10   :  { %26 = vsyncpa [#allocation5], 0 }
  0x11   :  { %28 = vsyncpa [#allocation5 + $0x1], 0  ;;  %s2454_s2 = smov 0   ;;  %s2456_s25 = smov 0  }
  0x12   :  { %s2458_s26 = smov 0   ;;  %s2460_s27 = smov 0  }
  0x13   :  { %s2462_s3 = smov 0   ;;  %s2464_s28 = smov 0  }
  0x14   :  { %s2466_s29 = smov 0   ;;  %s2468_s0 = smov 0  }
  0x15   :  { %s2470_s4 = smov 0   ;;  %s2472_s30 = smov 0  }
  0x16 LB: > { %2936 = sst [smem:[#allocation7_spill]] %s2302_s2  ;;  %s1831_s5 = sadd.s32 4294967295, %s2338_s30   ;;  %s2338_s30 = sphi %s2472_s30, %s34_s30   ;;  %s2334_s4 = sphi %s2470_s4, %s2982_s4   ;;  %s2330_s0 = sphi %s2468_s0, %s2981_s0   ;;  %s2326_s29 = sphi %s2466_s29, %s2980_s29   ;;  %s2322_s28 = sphi %s2464_s28, %s2979_s28   ;;  %s2318_s3 = sphi %s2462_s3, %s2978_s3   ;;  %s2314_s27 = sphi %s2460_s27, %s2977_s27   ;;  %s2310_s26 = sphi %s2458_s26, %s2976_s26   ;;  %s2306_s25 = sphi %s2456_s25, %s2975_s25   ;;  %s2302_s2 = sphi %s2454_s2, %s2974_s2  }
  0x17   : > { %2937 = sst [smem:[#allocation8_spill]] %s2306_s25  ;;  %s1832_s22 = sadd.s32 4294967294, %s2338_s30  }
  0x18   : > { %2938 = sst [smem:[#allocation9_spill]] %s2310_s26  ;;  %s43_s23 = sadd.s32 1, %s2330_s0 }
  0x19   : > { %2939 = sst [smem:[#allocation10_spill]] %s2318_s3  ;;  %s46_s1 = sadd.s32 1, %s2334_s4 }
  0x1a   : > { %2940 = sst [smem:[#allocation11_spill]] %s2330_s0  ;;  %p44_p0 = scmp.ge.s32.totalorder %s43_s23, 2 }
  0x1b   : > { %2941 = sst [smem:[#allocation12_spill]] %s2334_s4  ;;  %s394_s24 = sadd.s32 1, %s2318_s3 }
  0x1c   : > { %2942 = sst [smem:[#allocation13_spill]] %s2338_s30  ;;  %p401_p1 = scmp.ne.s32.totalorder %s2318_s3, %s2314_s27 }
  0x1d   : > { %p402_p2 = scmp.eq.s32.totalorder %s2338_s30, 0  ;;  %s2984_s23 = smov (%p44_p0, %s43_s23), 0 }
  0x1e   : > { %2943 = sst [smem:[#allocation14_spill]] %s2984_s23  ;;  %s2986_s1 = smov (!%p44_p0, %s46_s1), %s2334_s4 }
  0x1f   : > { %s391_s21 = ssub.s32 %s2330_s0, %s2984_s23  ;;  %p2517_p3 = por %p402_p2, %p401_p1 }
  0x20   : > { %p48_p4 = scmp.ge.s32.totalorder %s2986_s1, 2  ;;  %p392_p5 = scmp.eq.s32.totalorder %s391_s21, 0 }
  0x21   : > { %s526_s15 = sadd.s32 1, %s2310_s26  ;;  %p536_p6 = scmp.ne.s32.totalorder %s2310_s26, %s2306_s25 }
  0x22   : > { %s2988_s1 = smov (%p48_p4, %s2986_s1), 0  ;;  %p537_p7 = scmp.eq.s32.totalorder %s1831_s5, 3 }
  0x23   : > { %2945 = sst [smem:[#allocation15_spill]] %s2988_s1  ;;  %s521_s12 = ssub.s32 %s2334_s4, %s2988_s1 }
  0x24   : > { %s2527_s13 = scalar_select %p392_p5, %s2318_s3, %s394_s24  }
  0x25   : > { %s523_s9 = sor.u32 %s521_s12, %s391_s21  ;;  %p542_p8 = scmp.ne.s32.totalorder %s2306_s25, %s2302_s2 }
  0x26   : > { %2946 = sst [smem:[#allocation16_spill]] %s2527_s13  ;;  %p524_p9 = scmp.eq.s32.totalorder %s523_s9, 0 }
  0x27   : > { %p2533_p10 = por %p537_p7, %p536_p6  ;;  %p543_p11 = scmp.eq.s32.totalorder %s1832_s22, 3 }
  0x28   : > { %s2538_s10 = scalar_select %p524_p9, %s2310_s26, %s526_s15  }
  0x29   : > { %s2947_s23 = scalar_select %p2533_p10, 1, 0 }
  0x2a   : > { %2949 = sst [smem:[#allocation18_spill]] %s2538_s10  ;;  %p2540_p12 = por %p543_p11, %p542_p8 }
  0x2b   : > { %2948 = sst [smem:[#allocation17_spill]] %s2947_s23  ;;  %p1834_p13 = scmp.ge.s32.totalorder %s2338_s30, 4 }
  0x2c   : > { %s2950_s8 = scalar_select %p2540_p12, 1, 0 }
  0x2d   : > { %604 = sbr.rel (%p1834_p13) target bundleno = 65 (0x41), region = 76 }
  0x2e   : > { %2951 = sst [smem:[#allocation19_spill]] %s2950_s8 }
  0x32   : > { %616 = sbr.rel (!%p2517_p3) target bundleno = 65 (0x41), region = 84  ;;  %s618_s9 = sand.u32 (%p2517_p3), 1, %s2318_s3  }
  0x33   : > { %s1836_s12 = sshll.u32 (%p2517_p3), %s2330_s0, 2  ;;  %s1835_s21 = sshll.u32 (%p2517_p3), %s618_s9, 5 }
  0x34   : > { %s2952_s16 = sld [smem:[#allocation33_spill]] (%p2517_p3)  ;;  %s620_s22 = scalar_lea.vmem (%p2517_p3), [#allocation3], %s1835_s21 }
  0x3a   : > { %s622_s15 = scalar_lea.vmem %s2952_s16, %s1836_s12 }
  0x3b   : > { %v639_v0 = vld [vmem:[%s622_s15] sm:$0xf]  ;;  %v641_v1 = vld [vmem:[%s622_s15 + $0x8] sm:$0xf]  ;;  %v643_v2 = vld [vmem:[%s622_s15 + $0x10] sm:$0xf] }
  0x3c   : > { %640 = vst [vmem:[%s620_s22] sm:$0xf] %v639_v0  ;;  %642 = vst [vmem:[%s620_s22 + $0x4] sm:$0xf] %v641_v1  ;;  %v645_v3 = vld [vmem:[%s622_s15 + $0x18] sm:$0xf] }
  0x3d   : > { %v647_v4 = vld [vmem:[%s622_s15 + $0x20] sm:$0xf]  ;;  %644 = vst [vmem:[%s620_s22 + $0x8] sm:$0xf] %v643_v2  ;;  %646 = vst [vmem:[%s620_s22 + $0xc] sm:$0xf] %v645_v3 }
  0x3e   : > { %648 = vst [vmem:[%s620_s22 + $0x10] sm:$0xf] %v647_v4  ;;  %v649_v5 = vld [vmem:[%s622_s15 + $0x28] sm:$0xf]  ;;  %v651_v6 = vld [vmem:[%s622_s15 + $0x30] sm:$0xf] }
  0x3f   : > { %v653_v7 = vld [vmem:[%s622_s15 + $0x38] sm:$0xf]  ;;  %650 = vst [vmem:[%s620_s22 + $0x14] sm:$0xf] %v649_v5  ;;  %652 = vst [vmem:[%s620_s22 + $0x18] sm:$0xf] %v651_v6 }
  0x40   : > { %654 = vst [vmem:[%s620_s22 + $0x1c] sm:$0xf] %v653_v7 }
  0x41 PF: > { %p1837_p0 = scmp.ge.s32.totalorder %s2338_s30, 1  ;;  %p717_p1 = scmp.lt.s32.totalorder %s2338_s30, 5 }
  0x43   : > { %p718_p2 = pnand %p1837_p0, %p717_p1 }
  0x44   : > { %s724_s14 = sand.u32 (!%p718_p2), 1, %s2314_s27   ;;  %s2910_s9 = sand.u32 (!%p718_p2), 1, %s2306_s25  }
  0x45   : > { %721 = sbr.rel (%p718_p2) target bundleno = 1106 (0x452), region = 141  ;;  %s1838_s12 = sshll.u32 (!%p718_p2), %s724_s14, 5 }
  0x46   : > { %s1839_s21 = sshll.u32 (!%p718_p2), %s2910_s9, 6  ;;  %s1840_s5 = sshll.u32 (!%p718_p2), %s2326_s29, 3 }
  0x47   : > { %p806_p3 = scmp.lt.s32.totalorder (!%p718_p2), %s2322_s28, 1  ;;  %p801_p4 = scmp.lt.s32.totalorder (!%p718_p2), %s1840_s5, 15 }
  0x48   : > { %s2953_s26 = sld [smem:[#allocation20_spill]] (!%p718_p2)  ;;  %s2582_s25 = scalar_lea.vmem (!%p718_p2), [#allocation3], %s1838_s12 }
  0x49   : > { %s2584_s15 = scalar_lea.vmem (!%p718_p2), [#allocation4], %s1839_s21  ;;  %p1842_p5 = scmp.ne.s32.totalorder (!%p718_p2), %s2322_s28, 0 }
  0x4a   : > { %s2561_s24 = scalar_select %p806_p3, %s2322_s28, 1 }
  0x4b   : > { %s2990_s5 = smov (!%p801_p4, %s1840_s5), 15  ;;  %823 = sbr.rel (%p1842_p5) target bundleno = 829 (0x33d), region = 149 }
  0x4c   : > { %s808_s16 = scalar_lea.vmem %s2901_s17, %s2561_s24  ;;  %s811_s14 = scalar_lea.vmem %s2902_s18, %s2561_s24 }
  0x4d   : > { %s1841_s4 = sshll.u32 %s2990_s5, 3  ;;  %s814_s13 = scalar_lea.vmem %s2903_s19, %s2561_s24 }
  0x4e   : > { %s804_s8 = scalar_lea.vmem %s2953_s26, %s1841_s4  ;;  %s817_s23 = scalar_lea.vmem %s2904_s20, %s2561_s24 }
  0x4f   : > { %s2954_s22 = sld [smem:[#allocation21_spill]] (!%p1842_p5) }
  0x50   : > { %vm857_vm0 = vcmask 1043456   ;;  %v824_v9 = vld [vmem:[%s804_s8] sm:$0xff]  ;;  %v825_v10 = vld [vmem:[%s804_s8 + $0x8] sm:$0xff]  ;;  %vm844_vm1 = vcmask 64512   ;;  %v826_v15 = vld [vmem:[%s804_s8 + $0x10] sm:$0xff]  ;;  %s2955_s0 = sld [smem:[#allocation22_spill]] }
  0x51   : > { %v832_v12 = vpack.c.bf16 %v825_v10, %v824_v9  ;;  %v828_v13 = vld [vmem:[%s804_s8 + $0x20] sm:$0xff]  ;;  %v829_v14 = vld [vmem:[%s804_s8 + $0x28] sm:$0xff]  ;;  %v827_v17 = vld [vmem:[%s804_s8 + $0x18] sm:$0xff]  ;;  %s2956_s30 = sld [smem:[#allocation23_spill]]  ;;  %vm1046_vm2 = vcmask 130048   ;;  %vm1252_vm3 = vcmask 261120  }
  0x52   : > { %v834_v16 = vpack.c.bf16 %v829_v14, %v828_v13  ;;  %v830_v18 = vld [vmem:[%s804_s8 + $0x30] sm:$0xff]  ;;  %v831_v19 = vld [vmem:[%s804_s8 + $0x38] sm:$0xff]  ;;  %v833_v20 = vpack.c.bf16 %v827_v17, %v826_v15  ;;  %v2095_v22 = vld [vmem:[%s2890_s6] sm:$0xff]   ;;  %s2957_s21 = sld [smem:[#allocation25_spill]]  ;;  %vm1431_vm4 = vcmask 523264  }
  0x53   : > { %1947 = vmatprep.mubr.msk.bf16.mxu0 %vm844_vm1, %v832_v12  ;;  %v835_v21 = vpack.c.bf16 %v831_v19, %v830_v18  ;;  %s2958_s5 = sld [smem:[#allocation24_spill]] }
  0x54   : > { %1951 = vmatprep.mubr.msk.bf16.mxu1 %vm844_vm1, %v834_v16  ;;  %s2962_s2 = sld [smem:[#allocation29_spill]] }
  0x55   : > { %v836_v8 = vld [vmem:[%s2954_s22] sm:$0xf] }
  0x56   : > { %2003 = vmatprep.subr.msk.bf16.mxu0 %vm857_vm0, %v836_v8  ;;  %2004 = vmatprep.subr.msk.bf16.mxu1 %vm857_vm0, %v836_v8  ;;  %v859_v11 = vsel %vm857_vm0, %v836_v8, 0  ;;  %v1843_v23 = vld [vmem:[%s2955_s0] ss:$0 sm:$0xff]  ;;  %s2963_s0 = sld [smem:[#allocation30_spill]] }
  0x57   : > { %1946 = vmatpush3.bf16.msra.mxu0 %v859_v11  ;;  %1994 = vmatpush3.bf16.msra.mxu1 %v859_v11  ;;  %v1848_v25 = vld [vmem:[%s2956_s30] ss:$0 sm:$0xff]  ;;  %s2959_s30 = sld [smem:[#allocation26_spill]] }
  0x58   : > { %1955 = vmatprep.subr.bf16.mxu1 %v2095_v22  ;;  %v1857_v11 = vld [vmem:[%s2957_s21] ss:$0 sm:$0xff]  ;;  %s2960_s21 = sld [smem:[#allocation28_spill]] }
  0x59   : > { %v1858_v17 = vld [vmem:[%s2958_s5] ss:$0 sm:$0xff]  ;;  %s2961_s5 = sld [smem:[#allocation27_spill]] }
  0x5a   : > { %1948 = vmatmul.mubr.msk.bf16.vlgmr.msra.gmra.mxu0 %vm844_vm1, %v833_v20  ;;  %1952 = vmatmul.mubr.msk.bf16.vlgmr.msra.gmra.mxu1 %vm844_vm1, %v835_v21 }
  0x5b   : > { %1956 = vmatpush3.bf16.msra.mxu1 %v2095_v22 }
 0x11a   : > { %v1949_v24 = vpop.f32.mrf.mxu0  ;;  %v1953_v26 = vpop.f32.mrf.mxu1 }
 0x11b   : > { %v2603_v27 = vadd.f32 %v1949_v24, %v1843_v23  ;;  %v2605_v28 = vadd.f32 %v1953_v26, %v1843_v23 }
 0x11c   : > { %v895_v29 = vpop.f32.mrf.mxu0  ;;  %v911_v30 = vpop.f32.mrf.mxu1 }
 0x11d   : > { %v937_v31 = vmul.f32 %v1848_v25, %v2603_v27  ;;  %v941_v32 = vmul.f32 %v1848_v25, %v2605_v28  ;;  %v2609_v33 = vadd.f32 %v1843_v23, %v895_v29  ;;  %v2611_v34 = vadd.f32 %v1843_v23, %v911_v30 }
 0x11e   : > { %v1950_v35 = vpop.f32.mrf.mxu0  ;;  %v1954_v36 = vpop.f32.mrf.mxu1 }
 0x11f   : > { %v1851_v37 = vmul.f32 -1.442695, %v937_v31  ;;  %v935_v38 = vmul.f32 %v1848_v25, %v2609_v33  ;;  %v939_v39 = vmul.f32 %v1848_v25, %v2611_v34  ;;  %v1855_v40 = vmul.f32 -1.442695, %v941_v32 }
 0x120   : > { %v2615_v41 = vadd.f32 %v1950_v35, %v1843_v23  ;;  %v2617_v42 = vadd.f32 %v1954_v36, %v1843_v23  ;;  %v898_v43 = vpop.f32.mrf.mxu0  ;;  %v914_v44 = vpop.f32.mrf.mxu1 }
 0x121   : > { %2098 = vpow2.f32 %v1851_v37  ;;  %v1849_v45 = vmul.f32 -1.442695, %v935_v38  ;;  %v1853_v46 = vmul.f32 -1.442695, %v939_v39  ;;  %v2619_v47 = vadd.f32 %v1843_v23, %v898_v43 }
 0x122   : > { %v938_v48 = vmul.f32 %v1848_v25, %v2615_v41  ;;  %v942_v49 = vmul.f32 %v1848_v25, %v2617_v42  ;;  %v2623_v50 = vadd.f32 %v1843_v23, %v914_v44 }
 0x123   : > { %2100 = vpow2.f32 %v1849_v45  ;;  %v936_v51 = vmul.f32 %v1848_v25, %v2619_v47 }
 0x124   : > { %2102 = vpow2.f32 %v1853_v46  ;;  %v1852_v52 = vmul.f32 -1.442695, %v938_v48  ;;  %v1856_v53 = vmul.f32 -1.442695, %v942_v49  ;;  %v940_v54 = vmul.f32 %v1848_v25, %v2623_v50 }
 0x125   : > { %2104 = vpow2.f32 %v1855_v40  ;;  %v1850_v55 = vmul.f32 -1.442695, %v936_v51 }
 0x126   : > { %2106 = vpow2.f32 %v1852_v52  ;;  %v1854_v56 = vmul.f32 -1.442695, %v940_v54 }
 0x127   : > { %2108 = vpow2.f32 %v1856_v53 }
 0x128   : > { %2110 = vpow2.f32 %v1850_v55 }
 0x129   : > { %2112 = vpow2.f32 %v1854_v56 }
 0x12e   : > { %v2099_v57 = vpop.eup %2098 }
 0x12f   : > { %v969_v58 = vadd.f32 1.0, %v2099_v57 }
 0x130   : > { %v2101_v59 = vpop.eup %2100 }
 0x131   : > { %v2103_v60 = vpop.eup %2102  ;;  %v967_v61 = vadd.f32 1.0, %v2101_v59  ;;  %2114 = vrcp.f32 %v969_v58 }
 0x132   : > { %v2105_v62 = vpop.eup %2104  ;;  %v971_v63 = vadd.f32 1.0, %v2103_v60 }
 0x133   : > { %v2107_v0 = vpop.eup %2106  ;;  %2116 = vrcp.f32 %v967_v61  ;;  %v973_v7 = vadd.f32 1.0, %v2105_v62 }
 0x134   : > { %v2109_v1 = vpop.eup %2108  ;;  %2118 = vrcp.f32 %v971_v63  ;;  %v970_v2 = vadd.f32 1.0, %v2107_v0 }
 0x135   : > { %v2111_v3 = vpop.eup %2110  ;;  %v974_v4 = vadd.f32 1.0, %v2109_v1 }
 0x136   : > { %v2113_v5 = vpop.eup %2112  ;;  %2120 = vrcp.f32 %v970_v2  ;;  %v968_v6 = vadd.f32 1.0, %v2111_v3 }
 0x137   : > { %2122 = vrcp.f32 %v974_v4  ;;  %v972_v8 = vadd.f32 1.0, %v2113_v5 }
 0x138   : > { %2124 = vrcp.f32 %v968_v6 }
 0x139   : > { %2126 = vrcp.f32 %v972_v8 }
 0x13a   : > { %2128 = vrcp.f32 %v973_v7 }
 0x13e   : > { %v2115_v9 = vpop.eup %2114 }
 0x13f   : > { %v999_v15 = vmul.f32 %v2115_v9, %v1857_v11 }
 0x140   : > { %v2117_v10 = vpop.eup %2116 }
 0x141   : > { %v2119_v12 = vpop.eup %2118  ;;  %v997_v13 = vmul.f32 %v2117_v10, %v1857_v11  ;;  %v1013_v25 = vadd.f32 %v1858_v17, %v999_v15 }
 0x142   : > { %v1001_v18 = vmul.f32 %v2119_v12, %v1857_v11 }
 0x143   : > { %v2121_v14 = vpop.eup %2120  ;;  %v1011_v22 = vadd.f32 %v1858_v17, %v997_v13  ;;  %v1021_v39 = vmul.f32 %v1013_v25, %v2603_v27  ;;  %v2096_v27 = vld [vmem:[%s2895_s11 + $0x8] sm:$0xff]  }
 0x144   : > { %v2123_v16 = vpop.eup %2122  ;;  %v1000_v19 = vmul.f32 %v2121_v14, %v1857_v11  ;;  %v1015_v30 = vadd.f32 %v1858_v17, %v1001_v18  ;;  %1965 = vmatprep.subr.bf16.mxu0 %v2096_v27 }
 0x145   : > { %v2125_v20 = vpop.eup %2124  ;;  %v1004_v35 = vmul.f32 %v2123_v16, %v1857_v11  ;;  %v1019_v37 = vmul.f32 %v1011_v22, %v2609_v33  ;;  %1966 = vmatpush3.bf16.msra.mxu0 %v2096_v27 }
 0x146   : > { %v2127_v21 = vpop.eup %2126  ;;  %v1014_v23 = vadd.f32 %v1858_v17, %v1000_v19  ;;  %v998_v24 = vmul.f32 %v2125_v20, %v1857_v11  ;;  %v1023_v44 = vmul.f32 %v1015_v30, %v2611_v34  ;;  %v2097_v34 = vld [vmem:[%s2895_s11] sm:$0xff]  }
 0x147   : > { %v1002_v26 = vmul.f32 %v2127_v21, %v1857_v11  ;;  %v2129_v29 = vpop.eup %2128  ;;  %v1018_v48 = vadd.f32 %v1858_v17, %v1004_v35  ;;  %1967 = vmatprep.subr.bf16.mxu0 %v2097_v34 }
 0x148   : > { %v1012_v31 = vadd.f32 %v1858_v17, %v998_v24  ;;  %v1022_v32 = vmul.f32 %v1014_v23, %v2615_v41  ;;  %v1003_v40 = vmul.f32 %v2129_v29, %v1857_v11 }
 0x149   : > { %v1016_v36 = vadd.f32 %v1858_v17, %v1002_v26  ;;  %v1026_v33 = vmul.f32 %v1018_v48, %v2617_v42  ;;  %1968 = vmatpush3.bf16.msra.mxu0 %v2097_v34  ;;  %v1859_v42 = vld [vmem:[%s2891_s7] ss:$0 sm:$0xff] }
 0x14a   : > { %v1020_v38 = vmul.f32 %v1012_v31, %v2619_v47  ;;  %v1028_v46 = vpack.c.bf16 %v1022_v32, %v1021_v39  ;;  %v1017_v41 = vadd.f32 %v1858_v17, %v1003_v40  ;;  %v1874_v40 = vld [vmem:[%s2960_s21] ss:$0 sm:$0xff]  ;;  %s2965_s21 = sld [smem:[#allocation31_spill]] }
 0x14b   : > { %v1024_v43 = vmul.f32 %v1016_v36, %v2623_v50  ;;  %v1875_v48 = vld [vmem:[%s2961_s5] ss:$0 sm:$0xff] }
 0x14c   : > { %v1027_v45 = vpack.c.bf16 %v1020_v38, %v1019_v37  ;;  %v1025_v47 = vmul.f32 %v1017_v41, %v2605_v28  ;;  %v1865_v28 = vld [vmem:[%s2959_s30] ss:$0 sm:$0xff]  ;;  %s2964_s30 = sld [smem:[#allocation32_spill]] }
 0x14d   : > { %v1029_v49 = vpack.c.bf16 %v1024_v43, %v1023_v44 }
 0x14e   : > { %1957 = vmatprep.mubr.msk.bf16.mxu1 %vm1046_vm2, %v1027_v45  ;;  %v1030_v51 = vpack.c.bf16 %v1026_v33, %v1025_v47 }
 0x14f   : > { %1958 = vmatmul.mubr.msk.bf16.vlgmr.msra.gmra.mxu1 %vm1046_vm2, %v1028_v46 }
 0x150   : > { %1961 = vmatprep.mubr.msk.bf16.mxu1 %vm1046_vm2, %v1029_v49 }
 0x157   : > { %1962 = vmatmul.mubr.msk.bf16.gmra.mxu1 %vm1046_vm2, %v1030_v51 }
 0x20f   : > { %v1959_v50 = vpop.f32.mrf.mxu1 }
 0x210   : > { %v2653_v52 = vadd.f32 %v1959_v50, %v1859_v42 }
 0x211   : > { %v1093_v53 = vpop.f32.mrf.mxu1 }
 0x212   : > { %v1135_v54 = vmul.f32 %v1865_v28, %v2653_v52  ;;  %v2656_v55 = vadd.f32 %v1859_v42, %v1093_v53 }
 0x213   : > { %v1960_v56 = vpop.f32.mrf.mxu1 }
 0x214   : > { %v1868_v57 = vmul.f32 -1.442695, %v1135_v54  ;;  %v1133_v58 = vmul.f32 %v1865_v28, %v2656_v55  ;;  %v2659_v59 = vadd.f32 %v1960_v56, %v1859_v42 }
 0x215   : > { %v1096_v60 = vpop.f32.mrf.mxu1 }
 0x216   : > { %2130 = vpow2.f32 %v1868_v57  ;;  %v1866_v61 = vmul.f32 -1.442695, %v1133_v58  ;;  %v1136_v62 = vmul.f32 %v1865_v28, %v2659_v59  ;;  %v2662_v63 = vadd.f32 %v1859_v42, %v1096_v60 }
 0x217   : > { %v1963_v0 = vpop.f32.mrf.mxu1 }
 0x218   : > { %2132 = vpow2.f32 %v1866_v61  ;;  %v1869_v1 = vmul.f32 -1.442695, %v1136_v62  ;;  %v1134_v2 = vmul.f32 %v1865_v28, %v2662_v63  ;;  %v2665_v3 = vadd.f32 %v1963_v0, %v1859_v42 }
 0x219   : > { %v1109_v4 = vpop.f32.mrf.mxu1 }
 0x21a   : > { %2134 = vpow2.f32 %v1869_v1  ;;  %v1867_v5 = vmul.f32 -1.442695, %v1134_v2  ;;  %v1139_v6 = vmul.f32 %v1865_v28, %v2665_v3  ;;  %v2668_v7 = vadd.f32 %v1859_v42, %v1109_v4 }
 0x21b   : > { %v1964_v8 = vpop.f32.mrf.mxu1 }
 0x21c   : > { %2136 = vpow2.f32 %v1867_v5  ;;  %v1872_v9 = vmul.f32 -1.442695, %v1139_v6  ;;  %v1137_v10 = vmul.f32 %v1865_v28, %v2668_v7  ;;  %v2671_v11 = vadd.f32 %v1964_v8, %v1859_v42 }
 0x21d   : > { %v1112_v12 = vpop.f32.mrf.mxu1 }
 0x21e   : > { %2138 = vpow2.f32 %v1872_v9  ;;  %v1870_v13 = vmul.f32 -1.442695, %v1137_v10  ;;  %v1140_v14 = vmul.f32 %v1865_v28, %v2671_v11  ;;  %v2674_v15 = vadd.f32 %v1859_v42, %v1112_v12  ;;  %v1876_v12 = vld [vmem:[%s2962_s2] ss:$0 sm:$0xff] }
 0x220   : > { %2140 = vpow2.f32 %v1870_v13  ;;  %v1873_v16 = vmul.f32 -1.442695, %v1140_v14  ;;  %v1138_v17 = vmul.f32 %v1865_v28, %v2674_v15 }
 0x222   : > { %2142 = vpow2.f32 %v1873_v16  ;;  %v1871_v18 = vmul.f32 -1.442695, %v1138_v17 }
 0x223   : > { %v2131_v19 = vpop.eup %2130 }
 0x224   : > { %v1167_v20 = vadd.f32 1.0, %v2131_v19  ;;  %2144 = vpow2.f32 %v1871_v18 }
 0x225   : > { %v2133_v21 = vpop.eup %2132 }
 0x226   : > { %v1165_v22 = vadd.f32 1.0, %v2133_v21  ;;  %2146 = vrcp.f32 %v1167_v20 }
 0x227   : > { %v2135_v23 = vpop.eup %2134 }
 0x228   : > { %2148 = vrcp.f32 %v1165_v22  ;;  %v1168_v24 = vadd.f32 1.0, %v2135_v23 }
 0x229   : > { %v2137_v25 = vpop.eup %2136 }
 0x22a   : > { %2150 = vrcp.f32 %v1168_v24  ;;  %v1166_v26 = vadd.f32 1.0, %v2137_v25 }
 0x22b   : > { %v2139_v29 = vpop.eup %2138 }
 0x22c   : > { %2152 = vrcp.f32 %v1166_v26  ;;  %v1171_v30 = vadd.f32 1.0, %v2139_v29 }
 0x22d   : > { %v2141_v31 = vpop.eup %2140 }
 0x22e   : > { %v1169_v32 = vadd.f32 1.0, %v2141_v31  ;;  %2154 = vrcp.f32 %v1171_v30 }
 0x22f   : > { %v2143_v35 = vpop.eup %2142 }
 0x230   : > { %2156 = vrcp.f32 %v1169_v32  ;;  %v1172_v36 = vadd.f32 1.0, %v2143_v35 }
 0x231   : > { %v2145_v37 = vpop.eup %2144 }
 0x232   : > { %2158 = vrcp.f32 %v1172_v36  ;;  %v1170_v38 = vadd.f32 1.0, %v2145_v37 }
 0x233   : > { %v2147_v39 = vpop.eup %2146 }
 0x234   : > { %2160 = vrcp.f32 %v1170_v38  ;;  %v1197_v46 = vmul.f32 %v2147_v39, %v1874_v40 }
 0x235   : > { %v2149_v43 = vpop.eup %2148 }
 0x236   : > { %v1195_v44 = vmul.f32 %v2149_v43, %v1874_v40  ;;  %v1211_v27 = vadd.f32 %v1875_v48, %v1197_v46 }
 0x237   : > { %v2151_v45 = vpop.eup %2150 }
 0x238   : > { %v1198_v49 = vmul.f32 %v2151_v45, %v1874_v40  ;;  %v1209_v33 = vadd.f32 %v1875_v48, %v1195_v44  ;;  %v1219_v58 = vmul.f32 %v1211_v27, %v2653_v52 }
 0x239   : > { %v2153_v41 = vpop.eup %2152 }
 0x23a   : > { %v1212_v47 = vadd.f32 %v1875_v48, %v1198_v49  ;;  %v1196_v51 = vmul.f32 %v2153_v41, %v1874_v40  ;;  %v1217_v53 = vmul.f32 %v1209_v33, %v2656_v55 }
 0x23b   : > { %v2155_v34 = vpop.eup %2154 }
 0x23c   : > { %v1210_v42 = vadd.f32 %v1875_v48, %v1196_v51  ;;  %v1220_v28 = vmul.f32 %v1212_v47, %v2659_v59  ;;  %v1201_v60 = vmul.f32 %v2155_v34, %v1874_v40 }
 0x23d   : > { %v2157_v50 = vpop.eup %2156 }
 0x23e   : > { %v1218_v54 = vmul.f32 %v1210_v42, %v2662_v63  ;;  %v1199_v56 = vmul.f32 %v2157_v50, %v1874_v40  ;;  %v1226_v1 = vpack.c.bf16 %v1220_v28, %v1219_v58  ;;  %v1215_v59 = vadd.f32 %v1875_v48, %v1201_v60 }
 0x23f   : > { %v2159_v57 = vpop.eup %2158 }
 0x240   : > { %v1225_v61 = vpack.c.bf16 %v1218_v54, %v1217_v53  ;;  %v1202_v62 = vmul.f32 %v2159_v57, %v1874_v40  ;;  %v1213_v2 = vadd.f32 %v1875_v48, %v1199_v56  ;;  %v1223_v8 = vmul.f32 %v1215_v59, %v2665_v3 }
 0x241   : > { %v2161_v0 = vpop.eup %2160 }
 0x242   : > { %v1216_v4 = vadd.f32 %v1875_v48, %v1202_v62  ;;  %v1200_v5 = vmul.f32 %v2161_v0, %v1874_v40  ;;  %1969 = vmatprep.mubr.msk.bf16.mxu0 %vm1252_vm3, %v1225_v61  ;;  %v1221_v6 = vmul.f32 %v1213_v2, %v2668_v7  ;;  %v1892_v61 = vld [vmem:[%s2964_s30] ss:$0 sm:$0xff] }
 0x243   : > { %1970 = vmatmul.mubr.msk.bf16.vlgmr.msra.gmra.mxu0 %vm1252_vm3, %v1226_v1  ;;  %v1893_v1 = vld [vmem:[%s2965_s21] ss:$0 sm:$0xff] }
 0x244   : > { %v1214_v55 = vadd.f32 %v1875_v48, %v1200_v5  ;;  %v1224_v63 = vmul.f32 %v1216_v4, %v2671_v11  ;;  %v1883_v11 = vld [vmem:[%s2963_s0] ss:$0 sm:$0xff] }
 0x246   : > { %v1222_v52 = vmul.f32 %v1214_v55, %v2674_v15  ;;  %v1228_v10 = vpack.c.bf16 %v1224_v63, %v1223_v8 }
 0x248   : > { %v1227_v9 = vpack.c.bf16 %v1222_v52, %v1221_v6 }
 0x24a   : > { %1973 = vmatprep.mubr.msk.bf16.mxu0 %vm1252_vm3, %v1227_v9 }
 0x24b   : > { %1974 = vmatmul.mubr.msk.bf16.gmra.mxu0 %vm1252_vm3, %v1228_v10 }
 0x303   : > { %v1971_v13 = vpop.f32.mrf.mxu0 }
 0x304   : > { %v2701_v7 = vadd.f32 %v1971_v13, %v1876_v12 }
 0x305   : > { %v1299_v14 = vpop.f32.mrf.mxu0 }
 0x306   : > { %v1341_v3 = vmul.f32 %v1883_v11, %v2701_v7  ;;  %v2704_v15 = vadd.f32 %v1876_v12, %v1299_v14 }
 0x307   : > { %v1972_v16 = vpop.f32.mrf.mxu0 }
 0x308   : > { %v1886_v17 = vmul.f32 -1.442695, %v1341_v3  ;;  %v1339_v18 = vmul.f32 %v1883_v11, %v2704_v15  ;;  %v2707_v19 = vadd.f32 %v1972_v16, %v1876_v12 }
 0x309   : > { %v1302_v20 = vpop.f32.mrf.mxu0 }
 0x30a   : > { %2162 = vpow2.f32 %v1886_v17  ;;  %v1884_v21 = vmul.f32 -1.442695, %v1339_v18  ;;  %v1342_v22 = vmul.f32 %v1883_v11, %v2707_v19  ;;  %v2710_v23 = vadd.f32 %v1876_v12, %v1302_v20 }
 0x30b   : > { %v1975_v24 = vpop.f32.mrf.mxu0 }
 0x30c   : > { %2164 = vpow2.f32 %v1884_v21  ;;  %v1887_v25 = vmul.f32 -1.442695, %v1342_v22  ;;  %v1340_v26 = vmul.f32 %v1883_v11, %v2710_v23  ;;  %v2713_v29 = vadd.f32 %v1975_v24, %v1876_v12 }
 0x30d   : > { %v1315_v30 = vpop.f32.mrf.mxu0 }
 0x30e   : > { %2166 = vpow2.f32 %v1887_v25  ;;  %v1885_v31 = vmul.f32 -1.442695, %v1340_v26  ;;  %v1345_v32 = vmul.f32 %v1883_v11, %v2713_v29  ;;  %v2716_v35 = vadd.f32 %v1876_v12, %v1315_v30 }
 0x30f   : > { %v1976_v36 = vpop.f32.mrf.mxu0 }
 0x310   : > { %2168 = vpow2.f32 %v1885_v31  ;;  %v1890_v37 = vmul.f32 -1.442695, %v1345_v32  ;;  %v1343_v38 = vmul.f32 %v1883_v11, %v2716_v35  ;;  %v2719_v39 = vadd.f32 %v1976_v36, %v1876_v12 }
 0x311   : > { %v1318_v40 = vpop.f32.mrf.mxu0 }
 0x312   : > { %2170 = vpow2.f32 %v1890_v37  ;;  %v1888_v43 = vmul.f32 -1.442695, %v1343_v38  ;;  %v1346_v44 = vmul.f32 %v1883_v11, %v2719_v39  ;;  %v2722_v45 = vadd.f32 %v1876_v12, %v1318_v40 }
 0x314   : > { %2172 = vpow2.f32 %v1888_v43  ;;  %v1891_v46 = vmul.f32 -1.442695, %v1346_v44  ;;  %v1344_v48 = vmul.f32 %v1883_v11, %v2722_v45 }
 0x316   : > { %2174 = vpow2.f32 %v1891_v46  ;;  %v1889_v49 = vmul.f32 -1.442695, %v1344_v48 }
 0x317   : > { %v2163_v41 = vpop.eup %2162 }
 0x318   : > { %v1373_v33 = vadd.f32 1.0, %v2163_v41  ;;  %2176 = vpow2.f32 %v1889_v49 }
 0x319   : > { %v2165_v47 = vpop.eup %2164 }
 0x31a   : > { %2178 = vrcp.f32 %v1373_v33  ;;  %v1371_v51 = vadd.f32 1.0, %v2165_v47 }
 0x31b   : > { %v2167_v27 = vpop.eup %2166 }
 0x31c   : > { %2180 = vrcp.f32 %v1371_v51  ;;  %v1374_v34 = vadd.f32 1.0, %v2167_v27 }
 0x31d   : > { %v2169_v42 = vpop.eup %2168 }
 0x31e   : > { %2182 = vrcp.f32 %v1374_v34  ;;  %v1372_v50 = vadd.f32 1.0, %v2169_v42 }
 0x31f   : > { %v2171_v28 = vpop.eup %2170 }
 0x320   : > { %2184 = vrcp.f32 %v1372_v50  ;;  %v1377_v53 = vadd.f32 1.0, %v2171_v28 }
 0x321   : > { %v2173_v54 = vpop.eup %2172 }
 0x322   : > { %2186 = vrcp.f32 %v1377_v53  ;;  %v1375_v56 = vadd.f32 1.0, %v2173_v54 }
 0x323   : > { %v2175_v57 = vpop.eup %2174 }
 0x324   : > { %2188 = vrcp.f32 %v1375_v56  ;;  %v1378_v58 = vadd.f32 1.0, %v2175_v57 }
 0x325   : > { %v2177_v60 = vpop.eup %2176 }
 0x326   : > { %2190 = vrcp.f32 %v1378_v58  ;;  %v1376_v62 = vadd.f32 1.0, %v2177_v60 }
 0x327   : > { %v2179_v0 = vpop.eup %2178 }
 0x328   : > { %v1403_v2 = vmul.f32 %v2179_v0, %v1892_v61  ;;  %2192 = vrcp.f32 %v1376_v62 }
 0x329   : > { %v2181_v4 = vpop.eup %2180 }
 0x32a   : > { %v1417_v5 = vadd.f32 %v1893_v1, %v1403_v2  ;;  %v1401_v59 = vmul.f32 %v2181_v4, %v1892_v61 }
 0x32b   : > { %v2183_v55 = vpop.eup %2182 }
 0x32c   : > { %v1425_v63 = vmul.f32 %v1417_v5, %v2701_v7  ;;  %v1415_v6 = vadd.f32 %v1893_v1, %v1401_v59  ;;  %v1404_v52 = vmul.f32 %v2183_v55, %v1892_v61 }
 0x32d   : > { %v2185_v8 = vpop.eup %2184 }
 0x32e   : > { %1434 = vst.msk [vmem:[#allocation2 + $0x10] sm:$0xff] %vm1431_vm4, %v1425_v63  ;;  %v1423_v9 = vmul.f32 %v1415_v6, %v2704_v15  ;;  %v1418_v10 = vadd.f32 %v1893_v1, %v1404_v52  ;;  %v1402_v12 = vmul.f32 %v2185_v8, %v1892_v61 }
 0x32f   : > { %v2187_v13 = vpop.eup %2186 }
 0x330   : > { %1432 = vst.msk [vmem:[#allocation2] sm:$0xff] %vm1431_vm4, %v1423_v9  ;;  %v1426_v11 = vmul.f32 %v1418_v10, %v2707_v19  ;;  %v1416_v14 = vadd.f32 %v1893_v1, %v1402_v12  ;;  %v1407_v3 = vmul.f32 %v2187_v13, %v1892_v61 }
 0x331   : > { %v2189_v16 = vpop.eup %2188 }
 0x332   : > { %1435 = vst.msk [vmem:[#allocation2 + $0x18] sm:$0xff] %vm1431_vm4, %v1426_v11  ;;  %v1424_v7 = vmul.f32 %v1416_v14, %v2710_v23  ;;  %v1421_v17 = vadd.f32 %v1893_v1, %v1407_v3  ;;  %v1405_v18 = vmul.f32 %v2189_v16, %v1892_v61 }
 0x333   : > { %v2191_v20 = vpop.eup %2190 }
 0x334   : > { %1433 = vst.msk [vmem:[#allocation2 + $0x8] sm:$0xff] %vm1431_vm4, %v1424_v7  ;;  %v1429_v15 = vmul.f32 %v1421_v17, %v2713_v29  ;;  %v1419_v21 = vadd.f32 %v1893_v1, %v1405_v18  ;;  %v1408_v22 = vmul.f32 %v2191_v20, %v1892_v61 }
 0x335   : > { %v2193_v24 = vpop.eup %2192 }
 0x336   : > { %1438 = vst.msk [vmem:[#allocation2 + $0x30] sm:$0xff] %vm1431_vm4, %v1429_v15  ;;  %v1427_v19 = vmul.f32 %v1419_v21, %v2716_v35  ;;  %v1422_v25 = vadd.f32 %v1893_v1, %v1408_v22  ;;  %v1406_v26 = vmul.f32 %v2193_v24, %v1892_v61 }
 0x338   : > { %1436 = vst.msk [vmem:[#allocation2 + $0x20] sm:$0xff] %vm1431_vm4, %v1427_v19  ;;  %v1430_v23 = vmul.f32 %v1422_v25, %v2719_v39  ;;  %v1420_v30 = vadd.f32 %v1893_v1, %v1406_v26 }
 0x33a   : > { %1439 = vst.msk [vmem:[#allocation2 + $0x38] sm:$0xff] %vm1431_vm4, %v1430_v23  ;;  %v1428_v31 = vmul.f32 %v1420_v30, %v2722_v45 }
 0x33c   : > { %1437 = vst.msk [vmem:[#allocation2 + $0x28] sm:$0xff] %vm1431_vm4, %v1428_v31 }
 0x33d PF: > { %v2194_v29 = vld [vmem:[%s2582_s25 + $0x18] sm:$0xff]   ;;  %v2195_v32 = vld [vmem:[%s2582_s25 + $0x10] sm:$0xff]   ;;  %v2196_v35 = vld [vmem:[%s2582_s25 + $0x8] sm:$0xff]   ;;  %vm1491_vm5 = vcmask 523264   ;;  %s1920_s2 = sshll.u32 %s2326_s29, 4  ;;  %s2966_s29 = sld [smem:[#allocation8_spill]] }
 0x33e   : > { %1977 = vmatprep.subr.bf16.mxu0 %v2194_v29  ;;  %1995 = vmatprep.subr.bf16.mxu1 %v2194_v29  ;;  %v1440_v36 = vld [vmem:[#allocation2] sm:$0xff]  ;;  %v1441_v37 = vld [vmem:[#allocation2 + $0x8] sm:$0xff]  ;;  %v1442_v45 = vld [vmem:[#allocation2 + $0x10] sm:$0xff]  ;;  %s2968_s0 = sld [smem:[#allocation34_spill]]  ;;  %s2340_s21 = smov [#allocation4]  }
 0x33f   : > { %1978 = vmatpush3.bf16.msra.mxu0 %v2194_v29  ;;  %1999 = vmatpush3.bf16.msra.mxu1 %v2194_v29  ;;  %v1444_v38 = vld [vmem:[#allocation2 + $0x20] sm:$0xff]  ;;  %v1448_v39 = vpack.c.bf16 %v1441_v37, %v1440_v36  ;;  %v1443_v46 = vld [vmem:[#allocation2 + $0x18] sm:$0xff]  ;;  %v1446_v48 = vld [vmem:[#allocation2 + $0x30] sm:$0xff] }
 0x340   : > { %1979 = vmatprep.subr.bf16.mxu0 %v2195_v32  ;;  %1996 = vmatprep.subr.bf16.mxu1 %v2195_v32  ;;  %v2197_v44 = vld [vmem:[%s2582_s25] sm:$0xff]   ;;  %v1449_v41 = vpack.c.bf16 %v1443_v46, %v1442_v45  ;;  %s2234_s25 = sshll.u32 %s2340_s21, 4  ;;  %s2235_s25 = int_to_ptr.vmem [resolvable:$false] %s2234_s25 }
 0x341   : > { %1985 = vmatprep.mubr.msk.bf16.mxu0 %vm1491_vm5, %v1448_v39  ;;  %v1447_v49 = vld [vmem:[#allocation2 + $0x38] sm:$0xff]  ;;  %v1894_v47 = vld [vmem:[%s808_s16] ss:$0 sm:$0xff]  ;;  %s2236_s27 = scalar_lea.vmem %s2235_s25, 2048 }
 0x342   : > { %v1451_v33 = vpack.c.bf16 %v1447_v49, %v1446_v48  ;;  %v1903_v27 = vld [vmem:[%s811_s14] ss:$0 sm:$0xff] }
 0x343   : > { %v1445_v40 = vld [vmem:[#allocation2 + $0x28] sm:$0xff]  ;;  %1980 = vmatpush3.bf16.msra.mxu0 %v2195_v32  ;;  %2000 = vmatpush3.bf16.msra.mxu1 %v2195_v32  ;;  %v1913_v37 = vld [vmem:[%s814_s13] ss:$0 sm:$0xff]  ;;  %s1699_s13 = sadd.s32 %s2322_s28, %s1920_s2  ;;  %s2970_s30 = sand.u32 1, %s2966_s29  }
 0x344   : > { %v1450_v43 = vpack.c.bf16 %v1445_v40, %v1444_v38  ;;  %1981 = vmatprep.subr.bf16.mxu0 %v2196_v35  ;;  %1997 = vmatprep.subr.bf16.mxu1 %v2196_v35  ;;  %s1917_s28 = sshll.u32 %s1699_s13, 7  ;;  %s2969_s8 = smov %s2968_s0 }
 0x345   : > { %s2817_s4 = scalar_lea.hbm %s2968_s0, %s1917_s28  ;;  %s2827_s9 = scalar_lea.sflag [#allocation5], %s2970_s30 }
 0x346   : > { %1989 = vmatprep.mubr.msk.bf16.mxu1 %vm1491_vm5, %v1450_v43 }
 0x347   : > { %1982 = vmatpush3.bf16.msra.mxu0 %v2196_v35  ;;  %2001 = vmatpush3.bf16.msra.mxu1 %v2196_v35  ;;  %v1912_v35 = vld [vmem:[%s817_s23] ss:$0 sm:$0xff]  ;;  %s1702_s23 = sshll.u32 %s2584_s15, 4  ;;  %s2820_s23 = int_to_ptr.vmem [resolvable:$true] %s1702_s23 }
 0x348   : > { %1983 = vmatprep.subr.bf16.mxu0 %v2197_v44  ;;  %1998 = vmatprep.subr.bf16.mxu1 %v2197_v44  ;;  %s2230_s12 = scalar_lea.vmem %s2820_s23, 1024  ;;  %p2237_p9 = scmp.lt.s32.totalorder %s2820_s23, %s2235_s25 }
 0x349   : > { %p2231_p6 = scmp.ne.s32.totalorder %s2820_s23, %s2230_s12  ;;  %p2238_p11 = scmp.lt.s32.totalorder %s2236_s27, %s2230_s12 }
 0x34b   : > { %1984 = vmatpush3.bf16.msra.mxu0 %v2197_v44  ;;  %2002 = vmatpush3.bf16.msra.mxu1 %v2197_v44  ;;  %p2232_p7 = pnand %p2231_p6, %p2533_p10  ;;  %p2239_p13 = por %p2238_p11, %p2237_p9 }
 0x34d   : > { %p2233_p8 = pneg %p2232_p7 }
 0x34e   : > { %1986 = vmatmul.mubr.msk.bf16.vlgmr.msra.gmra.mxu0 %vm1491_vm5, %v1449_v41  ;;  %1990 = vmatmul.mubr.msk.bf16.vlgmr.msra.gmra.mxu1 %vm1491_vm5, %v1451_v33 }
 0x34f   : > { %p2240_p0 = pnand %p2239_p13, %p2233_p8 }
 0x40e   : > { %v1987_v51 = vpop.f32.mrf.mxu0  ;;  %v1991_v34 = vpop.f32.mrf.mxu1 }
 0x40f   : > { %v2765_v42 = vadd.f32 %v1987_v51, %v1894_v47  ;;  %v2767_v50 = vadd.f32 %v1991_v34, %v1894_v47 }
 0x410   : > { %v1538_v28 = vpop.f32.mrf.mxu0  ;;  %v1554_v53 = vpop.f32.mrf.mxu1 }
 0x411   : > { %v1580_v54 = vmul.f32 %v1903_v27, %v2765_v42  ;;  %v1584_v56 = vmul.f32 %v1903_v27, %v2767_v50  ;;  %v2771_v57 = vadd.f32 %v1894_v47, %v1538_v28  ;;  %v2773_v58 = vadd.f32 %v1894_v47, %v1554_v53 }
 0x412   : > { %v1988_v60 = vpop.f32.mrf.mxu0  ;;  %v1992_v61 = vpop.f32.mrf.mxu1 }
 0x413   : > { %v1906_v62 = vmul.f32 -1.442695, %v1580_v54  ;;  %v1910_v0 = vmul.f32 -1.442695, %v1584_v56  ;;  %v1578_v1 = vmul.f32 %v1903_v27, %v2771_v57  ;;  %v1582_v2 = vmul.f32 %v1903_v27, %v2773_v58 }
 0x414   : > { %v2777_v4 = vadd.f32 %v1988_v60, %v1894_v47  ;;  %v2779_v5 = vadd.f32 %v1992_v61, %v1894_v47  ;;  %v1541_v59 = vpop.f32.mrf.mxu0  ;;  %v1557_v55 = vpop.f32.mrf.mxu1 }
 0x415   : > { %2198 = vpow2.f32 %v1906_v62  ;;  %v1904_v63 = vmul.f32 -1.442695, %v1578_v1  ;;  %v1908_v6 = vmul.f32 -1.442695, %v1582_v2  ;;  %v2781_v52 = vadd.f32 %v1894_v47, %v1541_v59 }
 0x416   : > { %2200 = vpow2.f32 %v1910_v0  ;;  %v1581_v8 = vmul.f32 %v1903_v27, %v2777_v4  ;;  %v1585_v9 = vmul.f32 %v1903_v27, %v2779_v5  ;;  %v2785_v10 = vadd.f32 %v1894_v47, %v1557_v55 }
 0x417   : > { %2202 = vpow2.f32 %v1904_v63  ;;  %v1579_v12 = vmul.f32 %v1903_v27, %v2781_v52 }
 0x418   : > { %2204 = vpow2.f32 %v1908_v6  ;;  %v1907_v13 = vmul.f32 -1.442695, %v1581_v8  ;;  %v1911_v11 = vmul.f32 -1.442695, %v1585_v9  ;;  %v1583_v14 = vmul.f32 %v1903_v27, %v2785_v10 }
 0x419   : > { %v1905_v3 = vmul.f32 -1.442695, %v1579_v12 }
 0x41a   : > { %2206 = vpow2.f32 %v1907_v13  ;;  %v1909_v16 = vmul.f32 -1.442695, %v1583_v14 }
 0x41b   : > { %2208 = vpow2.f32 %v1911_v11 }
 0x41c   : > { %2210 = vpow2.f32 %v1905_v3 }
 0x41d   : > { %2212 = vpow2.f32 %v1909_v16 }
 0x422   : > { %v2199_v7 = vpop.eup %2198 }
 0x423   : > { %v2201_v17 = vpop.eup %2200  ;;  %v1612_v18 = vadd.f32 1.0, %v2199_v7 }
 0x424   : > { %v2203_v20 = vpop.eup %2202  ;;  %v1616_v15 = vadd.f32 1.0, %v2201_v17 }
 0x425   : > { %v2205_v21 = vpop.eup %2204  ;;  %2214 = vrcp.f32 %v1612_v18  ;;  %v1610_v22 = vadd.f32 1.0, %v2203_v20 }
 0x426   : > { %2216 = vrcp.f32 %v1616_v15  ;;  %v1614_v24 = vadd.f32 1.0, %v2205_v21 }
 0x427   : > { %v2207_v19 = vpop.eup %2206  ;;  %2218 = vrcp.f32 %v1610_v22 }
 0x428   : > { %v2209_v25 = vpop.eup %2208  ;;  %2220 = vrcp.f32 %v1614_v24  ;;  %v1613_v26 = vadd.f32 1.0, %v2207_v19 }
 0x429   : > { %v2211_v23 = vpop.eup %2210  ;;  %v1617_v30 = vadd.f32 1.0, %v2209_v25 }
 0x42a   : > { %v2213_v31 = vpop.eup %2212  ;;  %2222 = vrcp.f32 %v1613_v26  ;;  %v1611_v29 = vadd.f32 1.0, %v2211_v23 }
 0x42b   : > { %2224 = vrcp.f32 %v1617_v30  ;;  %v1615_v32 = vadd.f32 1.0, %v2213_v31 }
 0x42c   : > { %2226 = vrcp.f32 %v1611_v29 }
 0x42d   : > { %2228 = vrcp.f32 %v1615_v32 }
 0x432   : > { %v2215_v36 = vpop.eup %2214 }
 0x433   : > { %v2217_v38 = vpop.eup %2216  ;;  %v1642_v39 = vmul.f32 %v2215_v36, %v1912_v35 }
 0x434   : > { %v2219_v40 = vpop.eup %2218  ;;  %v1646_v43 = vmul.f32 %v2217_v38, %v1912_v35 }
 0x435   : > { %v2221_v44 = vpop.eup %2220  ;;  %v1656_v45 = vadd.f32 %v1913_v37, %v1642_v39  ;;  %v1640_v46 = vmul.f32 %v2219_v40, %v1912_v35 }
 0x436   : > { %v1660_v48 = vadd.f32 %v1913_v37, %v1646_v43  ;;  %v1644_v49 = vmul.f32 %v2221_v44, %v1912_v35 }
 0x437   : > { %v2223_v41 = vpop.eup %2222  ;;  %v1664_v33 = vmul.f32 %v1656_v45, %v2765_v42  ;;  %v1654_v47 = vadd.f32 %v1913_v37, %v1640_v46 }
 0x438   : > { %v2225_v51 = vpop.eup %2224  ;;  %v1668_v27 = vmul.f32 %v1660_v48, %v2767_v50  ;;  %v1658_v34 = vadd.f32 %v1913_v37, %v1644_v49  ;;  %v1643_v28 = vmul.f32 %v2223_v41, %v1912_v35 }
 0x439   : > { %v2227_v53 = vpop.eup %2226  ;;  %v1672_v54 = vadd.f32 1.0, %v1664_v33  ;;  %v1662_v56 = vmul.f32 %v1654_v47, %v2771_v57  ;;  %v1647_v60 = vmul.f32 %v2225_v51, %v1912_v35 }
 0x43a   : > { %v2229_v61 = vpop.eup %2228  ;;  %v1676_v62 = vadd.f32 1.0, %v1668_v27  ;;  %v1666_v42 = vmul.f32 %v1658_v34, %v2773_v58  ;;  %v1657_v0 = vadd.f32 %v1913_v37, %v1643_v28  ;;  %v1641_v1 = vmul.f32 %v2227_v53, %v1912_v35 }
 0x43b   : > { %1680 = vst [vmem:[%s2584_s15 + $0x10] sm:$0xff] %v1672_v54  ;;  %v1670_v50 = vadd.f32 1.0, %v1662_v56  ;;  %v1661_v2 = vadd.f32 %v1913_v37, %v1647_v60  ;;  %v1645_v59 = vmul.f32 %v2229_v61, %v1912_v35 }
 0x43c   : > { %1684 = vst [vmem:[%s2584_s15 + $0x30] sm:$0xff] %v1676_v62  ;;  %v1674_v55 = vadd.f32 1.0, %v1666_v42  ;;  %v1665_v57 = vmul.f32 %v1657_v0, %v2777_v4  ;;  %v1655_v63 = vadd.f32 %v1913_v37, %v1641_v1 }
 0x43d   : > { %1678 = vst [vmem:[%s2584_s15] sm:$0xff] %v1670_v50  ;;  %v1669_v58 = vmul.f32 %v1661_v2, %v2779_v5  ;;  %v1659_v6 = vadd.f32 %v1913_v37, %v1645_v59 }
 0x43e   : > { %1682 = vst [vmem:[%s2584_s15 + $0x20] sm:$0xff] %v1674_v55  ;;  %v1673_v8 = vadd.f32 1.0, %v1665_v57  ;;  %v1663_v9 = vmul.f32 %v1655_v63, %v2781_v52 }
 0x43f   : > { %v1677_v12 = vadd.f32 1.0, %v1669_v58  ;;  %v1667_v13 = vmul.f32 %v1659_v6, %v2785_v10 }
 0x440   : > { %1681 = vst [vmem:[%s2584_s15 + $0x18] sm:$0xff] %v1673_v8  ;;  %v1671_v4 = vadd.f32 1.0, %v1663_v9 }
 0x441   : > { %1685 = vst [vmem:[%s2584_s15 + $0x38] sm:$0xff] %v1677_v12  ;;  %v1675_v5 = vadd.f32 1.0, %v1667_v13 }
 0x442   : > { %1679 = vst [vmem:[%s2584_s15 + $0x8] sm:$0xff] %v1671_v4 }
 0x443   : > { %1683 = vst [vmem:[%s2584_s15 + $0x28] sm:$0xff] %v1675_v5 }
 0x444   : > { %2243 = shalt.err (!%p2240_p0)
}
 0x445   : > { %s2244_s15 = scalar_lea.hbm %s2817_s4, 1024  ;;  %s2248_s16 = scalar_lea.hbm %s2969_s8, 4096 }
 0x446   : > { %p2245_p1 = scmp.ne.s32.totalorder %s2817_s4, %s2244_s15  ;;  %p2249_p4 = scmp.lt.s32.totalorder %s2817_s4, %s2969_s8 }
 0x447   : > { %p2250_p5 = scmp.lt.s32.totalorder %s2248_s16, %s2244_s15 }
 0x448   : > { %p2246_p2 = pnand %p2245_p1, %p2533_p10 }
 0x449   : > { %p2251_p6 = por %p2250_p5, %p2249_p4 }
 0x44a   : > { %p2247_p3 = pneg %p2246_p2 }
 0x44c   : > { %p2252_p7 = pnand %p2251_p6, %p2247_p3 }
 0x44e   : > { %2255 = shalt.err (!%p2252_p7)
}
 0x44f   : > { %s2341_s10 = smov 128   ;;  %s2342_s2 = smov 256  }
 0x450   : > { %s2343_s13 = smov 8  }
 0x451   : > { %2005 = dma.vmem_to_hbm [thread:$0]  (%p2533_p10), %s2820_s23, 1024, %s2817_s4, %s2827_s9, %s2341_s10, %s2342_s2, %s2343_s13  }
 0x452 PF: > { %s2971_s28 = sld [smem:[#allocation13_spill]] }
 0x453   : > { %s2972_s29 = sld [smem:[#allocation7_spill]] }
 0x458   : > { %p2011_p8 = scmp.ge.s32.totalorder %s2971_s28, 2 }
 0x459   : > { %s1717_s3 = sand.u32 1, %s2972_s29  }
 0x45a   : > { %p2008_p9 = pnand %p2011_p8, %p2540_p12  ;;  %s1718_s0 = scalar_lea.sflag [#allocation5], %s1717_s3 }
 0x45c   : > { %p2009_p11 = pneg %p2008_p9 }
 0x45e   : > { %2297 = dma.done.wait (%p2009_p11), %s1718_s0, 1024  }
 0x45f   : > { %2299 = vsyncadd (%p2009_p11), %s1718_s0, 4294966272  ;;  %s34_s30 = sadd.s32 1, %s2971_s28   ;;  %s2974_s2 = sld [smem:[#allocation8_spill]] }
 0x460   : > { %p31_p13 = scmp.ge.s32.totalorder %s34_s30, 6   ;;  %s2975_s25 = sld [smem:[#allocation9_spill]] }
 0x461   : > { %s2976_s26 = sld [smem:[#allocation18_spill]] }
 0x462   : > { %s2977_s27 = sld [smem:[#allocation10_spill]] }
 0x463   : > { %s2978_s3 = sld [smem:[#allocation16_spill]]  ;;  %33 = sbr.rel (!%p31_p13) target bundleno = 22 (0x16), region = 204 }
 0x464   : > { %s2979_s28 = sld [smem:[#allocation11_spill]] }
 0x465   : > { %s2980_s29 = sld [smem:[#allocation12_spill]] }
 0x466   : > { %s2981_s0 = sld [smem:[#allocation14_spill]] }
 0x467   : > { %s2982_s4 = sld [smem:[#allocation15_spill]] }
 0x468   :  { %1723 = vsyncpa [#allocation5], 1 }
 0x469   :  { %1725 = vsyncpa [#allocation5 + $0x1], 1 }

</bundles_post_ra>
